<compile_context>
chip_gen: v7x
topology: tpu7x:2x2x1
jax: 0.10.0
libtpu: 0.0.40
codegen_flags: <defaults>
</compile_context>

<pallas_src>
import math

import jax
import jax.numpy as jnp
import numpy as np
from jax import lax
from jax.experimental import pallas as pl
from jax.experimental.pallas import tpu as pltpu

EMBED_DIM = 64
NUM_HEADS = 2          # kernel's roll trick assumes exactly 2 heads (module spec value)
DROPOUT_P = 0.1        # TODO(synk): stochastic dropout not implemented; eval-mode identity used.

_ROW_BLOCK_CAP = 1024              # ~8 MiB/tile -> fits default scoped VMEM on v5e/v6e/v7x
_VMEM_LIMIT_BYTES = 48 * 1024 * 1024   # headroom for double buffers; < v7x 64 MiB physical


def _round_up(x, m):
    return ((x + m - 1) // m) * m


def _attn_kernel(q_ref, k_ref, v_ref, wq_ref, wk_ref, wv_ref, o_ref):
    """One grid step == one block of B*L rows.
       q/k/v_ref: (rows, E) VMEM; w*_ref: (E, H*E) VMEM (pre-transposed, wq pre-scaled);
       o_ref: (rows, H*E)."""
    E = EMBED_DIM

    # Projections on the MXU; weights already in (in, out) layout; sqrt(E) folded into wq.
    q_full = jnp.dot(q_ref[...], wq_ref[...], preferred_element_type=jnp.float32)  # (rows, 2E)
    k_full = jnp.dot(k_ref[...], wk_ref[...], preferred_element_type=jnp.float32)  # (rows, 2E)
    v_full = jnp.dot(v_ref[...], wv_ref[...], preferred_element_type=jnp.float32)  # (rows, 2E)

    # Full 128-lane vreg math; roll swaps the two 64-lane head halves (XLU slot).
    k_roll = pltpu.roll(k_full, shift=E, axis=1)   # k1 | k0
    v_roll = pltpu.roll(v_full, shift=E, axis=1)   # v1 | v0
    prod_same = q_full * k_full                    # q0*k0 | q1*k1
    prod_cross = q_full * k_roll                   # q0*k1 | q1*k0

    # Per-(row, head-pair) scores via masked FULL-WIDTH reductions (no 64-lane slices,
    # so no relayout copies before the XLU reduce).  Already scaled by sqrt(E).
    lane = lax.broadcasted_iota(jnp.int32, q_full.shape, 1)
    left = lane < E
    zero = jnp.zeros_like(q_full)
    s00 = jnp.sum(jnp.where(left, prod_same, zero), axis=-1, keepdims=True)
    s11 = jnp.sum(jnp.where(left, zero, prod_same), axis=-1, keepdims=True)
    s01 = jnp.sum(jnp.where(left, prod_cross, zero), axis=-1, keepdims=True)
    s10 = jnp.sum(jnp.where(left, zero, prod_cross), axis=-1, keepdims=True)

    # Lane-dense softmax over j: lanes [0:E) carry head 0, lanes [E:2E) carry head 1.
    s_same = jnp.where(left, s00, s11)    # s[i][i]
    s_cross = jnp.where(left, s01, s10)   # s[i][1-i]
    m = jnp.maximum(s_same, s_cross)
    e_same = jnp.exp(s_same - m)
    e_cross = jnp.exp(s_cross - m)
    inv = pl.reciprocal(e_same + e_cross)  # exact (mem-bound kernel; keeps parity tight)

    # out_i = p[i,i]*v_i + p[i,1-i]*v_{1-i}; one unmasked lane-dense (rows, 128) store.
    o_ref[...] = ((e_same * inv) * v_full +
                  (e_cross * inv) * v_roll).astype(o_ref.dtype)


def model_forward(query, key, value, wq, wk, wv,
                  key_padding_mask=None, training=False):
    """query/key/value: (B, L, E) float32. wq/wk/wv: torch Linear layout (H*E, E).
       key_padding_mask / training accepted but unused (as in the original forward)."""
    del key_padding_mask, training
    query = jnp.asarray(query, jnp.float32)
    key = jnp.asarray(key, jnp.float32)
    value = jnp.asarray(value, jnp.float32)
    wq = jnp.asarray(wq, jnp.float32)
    wk = jnp.asarray(wk, jnp.float32)
    wv = jnp.asarray(wv, jnp.float32)

    B, L, E = query.shape
    HE = wq.shape[0]
    assert E == EMBED_DIM and HE == NUM_HEADS * EMBED_DIM
    # The module's einsum quirk binds 'h' to the sequence axis -> requires equal lengths.
    assert key.shape == (B, L, E) and value.shape == (B, L, E), \
        "quirky einsum 'bhie,bhje->bhij' requires Lq == Lk == Lv"

    # One-time (grid-invariant, tiny) weight prep: torch (out,in) -> (in,out) layout,
    # with the .div(1/sqrt(E)) == * sqrt(E) quirk folded into Wq.
    scale = math.sqrt(float(E))
    wq_t = (wq.T * scale).astype(jnp.float32)   # (E, H*E)
    wk_t = wk.T
    wv_t = wv.T

    # Each (b, l) row is independent -> flatten (B, L) into one row axis (free reshape).
    M = B * L
    q2 = query.reshape(M, E)
    k2 = key.reshape(M, E)
    v2 = value.reshape(M, E)

    # VMEM-budgeted row tiles: <=1024 rows each (~8 MiB incl. double buffers + temps),
    # many "parallel" grid steps -> proper DMA/compute pipelining and both TCs on v7x.
    block_rows = min(_ROW_BLOCK_CAP, _round_up(M, 8))
    num_blocks = -(-M // block_rows)      # ceil division
    M_pad = num_blocks * block_rows
    if M_pad != M:
        pad = M_pad - M
        q2 = jnp.pad(q2, ((0, pad), (0, 0)))
        k2 = jnp.pad(k2, ((0, pad), (0, 0)))
        v2 = jnp.pad(v2, ((0, pad), (0, 0)))

    out = pl.pallas_call(
        _attn_kernel,
        out_shape=jax.ShapeDtypeStruct((M_pad, HE), jnp.float32),
        grid_spec=pltpu.PrefetchScalarGridSpec(
            num_scalar_prefetch=0,
            grid=(num_blocks,),
            in_specs=[
                pl.BlockSpec((block_rows, E), lambda i: (i, 0)),
                pl.BlockSpec((block_rows, E), lambda i: (i, 0)),
                pl.BlockSpec((block_rows, E), lambda i: (i, 0)),
                pl.BlockSpec((E, HE), lambda i: (0, 0)),   # grid-invariant weights
                pl.BlockSpec((E, HE), lambda i: (0, 0)),
                pl.BlockSpec((E, HE), lambda i: (0, 0)),
            ],
            out_specs=pl.BlockSpec((block_rows, HE), lambda i: (i, 0)),
        ),
        compiler_params=pltpu.CompilerParams(
            dimension_semantics=("parallel",),
            vmem_limit_bytes=_VMEM_LIMIT_BYTES),
    )(q2, k2, v2, wq_t, wk_t, wv_t)

    if M_pad != M:
        out = out[:M]
    return out.reshape(B, L, HE)


def _reference(query, key, value, wq, wk, wv):
    """Pure-JAX reference mirroring the PyTorch forward (dropout = identity)."""
    B, L, E = query.shape
    H = NUM_HEADS
    q = (query @ wq.T).reshape(B, L, H, E)
    k = (key @ wk.T).reshape(B, L, H, E)
    v = (value @ wv.T).reshape(B, L, H, E)
    s = jnp.einsum('blie,blje->blij', q, k)
    s = s / (1.0 / math.sqrt(float(E)))
    p = jax.nn.softmax(s, axis=-1)
    out = jnp.einsum('blij,blje->blie', p, v)
    return out.reshape(B, L, H * E)


if __name__ == "__main__":
    B, L, E, H = 2, 8, EMBED_DIM, NUM_HEADS

    root = jax.random.PRNGKey(0)
    kq, kk, kv, kwq, kwk, kwv = jax.random.split(root, 6)

    query = jax.random.normal(kq, (B, L, E), dtype=jnp.float32)
    key = jax.random.normal(kk, (B, L, E), dtype=jnp.float32)
    value = jax.random.normal(kv, (B, L, E), dtype=jnp.float32)

    # torch.nn.Linear(E, H*E) weight layout: (out_features, in_features) = (H*E, E)
    bound = 1.0 / math.sqrt(E)
    wq = jax.random.uniform(kwq, (H * E, E), jnp.float32, -bound, bound)
    wk = jax.random.uniform(kwk, (H * E, E), jnp.float32, -bound, bound)
    wv = jax.random.uniform(kwv, (H * E, E), jnp.float32, -bound, bound)

    # Small shape consistent with the module (single-block path).
    out = model_forward(query, key, value, wq, wk, wv,
                        key_padding_mask=None, training=False)
    out = jax.block_until_ready(out)
    ref = _reference(query, key, value, wq, wk, wv)
    assert out.shape == (B, L, H * E), out.shape
    np.testing.assert_allclose(np.asarray(out), np.asarray(ref), rtol=2e-3, atol=2e-3)

    # Also exercise the multi-block tiled path (grid > 1, padded rows).
    B2, L2 = 3, 700
    kq2, kk2, kv2 = jax.random.split(jax.random.PRNGKey(1), 3)
    q_big = jax.random.normal(kq2, (B2, L2, E), dtype=jnp.float32)
    k_big = jax.random.normal(kk2, (B2, L2, E), dtype=jnp.float32)
    v_big = jax.random.normal(kv2, (B2, L2, E), dtype=jnp.float32)
    out_big = jax.block_until_ready(model_forward(q_big, k_big, v_big, wq, wk, wv))
    ref_big = _reference(q_big, k_big, v_big, wq, wk, wv)
    np.testing.assert_allclose(np.asarray(out_big), np.asarray(ref_big),
                               rtol=2e-3, atol=2e-3)

    print("KERNEL_OK")
</pallas_src>

<mosaic_0001>
module attributes {stable_mosaic.version = 11 : i64} {
  func.func @_attn_kernel(%arg0: i32, %arg1: memref<16x64xf32, #tpu.memory_space<vmem>>, %arg2: memref<16x64xf32, #tpu.memory_space<vmem>>, %arg3: memref<16x64xf32, #tpu.memory_space<vmem>>, %arg4: memref<64x128xf32, #tpu.memory_space<vmem>>, %arg5: memref<64x128xf32, #tpu.memory_space<vmem>>, %arg6: memref<64x128xf32, #tpu.memory_space<vmem>>, %arg7: memref<16x128xf32, #tpu.memory_space<vmem>>) attributes {dimension_semantics = [#tpu.dimension_semantics<parallel>], iteration_bounds = array<i64: 1>, scalar_prefetch = 0 : i64, scratch_operands = 0 : i64, tpu.core_type = #tpu.core_type<tc>, window_params = [{transform_indices = @transform_0, window_bounds = array<i64: 16, 64>}, {transform_indices = @transform_1, window_bounds = array<i64: 16, 64>}, {transform_indices = @transform_2, window_bounds = array<i64: 16, 64>}, {pipeline_mode = #tpu.pipeline_mode<synchronous>, transform_indices = @transform_3, window_bounds = array<i64: 64, 128>}, {pipeline_mode = #tpu.pipeline_mode<synchronous>, transform_indices = @transform_4, window_bounds = array<i64: 64, 128>}, {pipeline_mode = #tpu.pipeline_mode<synchronous>, transform_indices = @transform_5, window_bounds = array<i64: 64, 128>}, {transform_indices = @transform_6, window_bounds = array<i64: 16, 128>}]} {
    %c0 = arith.constant 0 : index
    %c0_0 = arith.constant 0 : index
    %0 = vector.load %arg1[%c0, %c0_0] : memref<16x64xf32, #tpu.memory_space<vmem>>, vector<16x64xf32>
    %c0_1 = arith.constant 0 : index
    %c0_2 = arith.constant 0 : index
    %1 = vector.load %arg4[%c0_1, %c0_2] : memref<64x128xf32, #tpu.memory_space<vmem>>, vector<64x128xf32>
    %cst = arith.constant dense<0.000000e+00> : vector<16x128xf32>
    %2 = tpu.matmul %0, %1, %cst {dimension_numbers = #tpu.dot_dimension_numbers<[1], [0], [0], [1], [0, 0, 1, 1], [], []>} : vector<16x64xf32>, vector<64x128xf32>, vector<16x128xf32> -> vector<16x128xf32>
    %c0_3 = arith.constant 0 : index
    %c0_4 = arith.constant 0 : index
    %3 = vector.load %arg2[%c0_3, %c0_4] : memref<16x64xf32, #tpu.memory_space<vmem>>, vector<16x64xf32>
    %c0_5 = arith.constant 0 : index
    %c0_6 = arith.constant 0 : index
    %4 = vector.load %arg5[%c0_5, %c0_6] : memref<64x128xf32, #tpu.memory_space<vmem>>, vector<64x128xf32>
    %cst_7 = arith.constant dense<0.000000e+00> : vector<16x128xf32>
    %5 = tpu.matmul %3, %4, %cst_7 {dimension_numbers = #tpu.dot_dimension_numbers<[1], [0], [0], [1], [0, 0, 1, 1], [], []>} : vector<16x64xf32>, vector<64x128xf32>, vector<16x128xf32> -> vector<16x128xf32>
    %c0_8 = arith.constant 0 : index
    %c0_9 = arith.constant 0 : index
    %6 = vector.load %arg3[%c0_8, %c0_9] : memref<16x64xf32, #tpu.memory_space<vmem>>, vector<16x64xf32>
    %c0_10 = arith.constant 0 : index
    %c0_11 = arith.constant 0 : index
    %7 = vector.load %arg6[%c0_10, %c0_11] : memref<64x128xf32, #tpu.memory_space<vmem>>, vector<64x128xf32>
    %cst_12 = arith.constant dense<0.000000e+00> : vector<16x128xf32>
    %8 = tpu.matmul %6, %7, %cst_12 {dimension_numbers = #tpu.dot_dimension_numbers<[1], [0], [0], [1], [0, 0, 1, 1], [], []>} : vector<16x64xf32>, vector<64x128xf32>, vector<16x128xf32> -> vector<16x128xf32>
    %c64_i32 = arith.constant 64 : i32
    %9 = tpu.dynamic_rotate %5 by %c64_i32 dim 1 : vector<16x128xf32>, i32 -> vector<16x128xf32>
    %c64_i32_13 = arith.constant 64 : i32
    %10 = tpu.dynamic_rotate %8 by %c64_i32_13 dim 1 : vector<16x128xf32>, i32 -> vector<16x128xf32>
    %11 = arith.mulf %2, %5 : vector<16x128xf32>
    %12 = arith.mulf %2, %9 : vector<16x128xf32>
    %13 = tpu.iota {dimensions = array<i32: 1>} : vector<16x128xi32>
    %c64_i32_14 = arith.constant 64 : i32
    %14 = vector.broadcast %c64_i32_14 : i32 to vector<16x128xi32>
    %15 = arith.cmpi slt, %13, %14 : vector<16x128xi32>
    %cst_15 = arith.constant 0.000000e+00 : f32
    %16 = vector.broadcast %cst_15 : f32 to vector<16x128xf32>
    %17 = arith.select %15, %11, %16 : vector<16x128xi1>, vector<16x128xf32>
    %cst_16 = arith.constant dense<0.000000e+00> : vector<16xf32>
    %18 = vector.multi_reduction <add>, %17, %cst_16 [1] : vector<16x128xf32> to vector<16xf32>
    %19 = vector.shape_cast %18 : vector<16xf32> to vector<16x1xf32>
    %20 = arith.select %15, %16, %11 : vector<16x128xi1>, vector<16x128xf32>
    %cst_17 = arith.constant dense<0.000000e+00> : vector<16xf32>
    %21 = vector.multi_reduction <add>, %20, %cst_17 [1] : vector<16x128xf32> to vector<16xf32>
    %22 = vector.shape_cast %21 : vector<16xf32> to vector<16x1xf32>
    %23 = arith.select %15, %12, %16 : vector<16x128xi1>, vector<16x128xf32>
    %cst_18 = arith.constant dense<0.000000e+00> : vector<16xf32>
    %24 = vector.multi_reduction <add>, %23, %cst_18 [1] : vector<16x128xf32> to vector<16xf32>
    %25 = vector.shape_cast %24 : vector<16xf32> to vector<16x1xf32>
    %26 = arith.select %15, %16, %12 : vector<16x128xi1>, vector<16x128xf32>
    %cst_19 = arith.constant dense<0.000000e+00> : vector<16xf32>
    %27 = vector.multi_reduction <add>, %26, %cst_19 [1] : vector<16x128xf32> to vector<16xf32>
    %28 = vector.shape_cast %27 : vector<16xf32> to vector<16x1xf32>
    %29 = vector.shape_cast %19 : vector<16x1xf32> to vector<16x1xf32>
    %30 = vector.broadcast %29 : vector<16x1xf32> to vector<16x128xf32>
    %31 = vector.shape_cast %22 : vector<16x1xf32> to vector<16x1xf32>
    %32 = vector.broadcast %31 : vector<16x1xf32> to vector<16x128xf32>
    %33 = arith.select %15, %30, %32 : vector<16x128xi1>, vector<16x128xf32>
    %34 = vector.shape_cast %25 : vector<16x1xf32> to vector<16x1xf32>
    %35 = vector.broadcast %34 : vector<16x1xf32> to vector<16x128xf32>
    %36 = vector.shape_cast %28 : vector<16x1xf32> to vector<16x1xf32>
    %37 = vector.broadcast %36 : vector<16x1xf32> to vector<16x128xf32>
    %38 = arith.select %15, %35, %37 : vector<16x128xi1>, vector<16x128xf32>
    %39 = arith.maximumf %33, %38 : vector<16x128xf32>
    %40 = arith.subf %33, %39 : vector<16x128xf32>
    %41 = math.exp %40 : vector<16x128xf32>
    %42 = arith.subf %38, %39 : vector<16x128xf32>
    %43 = math.exp %42 : vector<16x128xf32>
    %44 = arith.addf %41, %43 : vector<16x128xf32>
    %45 = tpu.reciprocal %44 : vector<16x128xf32> -> vector<16x128xf32>
    %46 = arith.mulf %41, %45 : vector<16x128xf32>
    %47 = arith.mulf %46, %8 : vector<16x128xf32>
    %48 = arith.mulf %43, %45 : vector<16x128xf32>
    %49 = arith.mulf %48, %10 : vector<16x128xf32>
    %50 = arith.addf %47, %49 : vector<16x128xf32>
    %c0_20 = arith.constant 0 : index
    %c0_21 = arith.constant 0 : index
    %51 = vector.load %arg7[%c0_20, %c0_21] : memref<16x128xf32, #tpu.memory_space<vmem>>, vector<16x128xf32>
    tpu.vector_store %arg7[%c0_20, %c0_21], %50 {strides = array<i32>} : memref<16x128xf32, #tpu.memory_space<vmem>>, vector<16x128xf32>,
    return
  }
  func.func @transform_0(%arg0: i32) -> (i32, i32) {
    %c0_i32 = arith.constant 0 : i32
    %c0_i32_0 = arith.constant 0 : i32
    return %arg0, %c0_i32 : i32, i32
  }
  func.func @transform_1(%arg0: i32) -> (i32, i32) {
    %c0_i32 = arith.constant 0 : i32
    %c0_i32_0 = arith.constant 0 : i32
    return %arg0, %c0_i32 : i32, i32
  }
  func.func @transform_2(%arg0: i32) -> (i32, i32) {
    %c0_i32 = arith.constant 0 : i32
    %c0_i32_0 = arith.constant 0 : i32
    return %arg0, %c0_i32 : i32, i32
  }
  func.func @transform_3(%arg0: i32) -> (i32, i32) {
    %c0_i32 = arith.constant 0 : i32
    %c0_i32_0 = arith.constant 0 : i32
    %c0_i32_1 = arith.constant 0 : i32
    return %c0_i32, %c0_i32_0 : i32, i32
  }
  func.func @transform_4(%arg0: i32) -> (i32, i32) {
    %c0_i32 = arith.constant 0 : i32
    %c0_i32_0 = arith.constant 0 : i32
    %c0_i32_1 = arith.constant 0 : i32
    return %c0_i32, %c0_i32_0 : i32, i32
  }
  func.func @transform_5(%arg0: i32) -> (i32, i32) {
    %c0_i32 = arith.constant 0 : i32
    %c0_i32_0 = arith.constant 0 : i32
    %c0_i32_1 = arith.constant 0 : i32
    return %c0_i32, %c0_i32_0 : i32, i32
  }
  func.func @transform_6(%arg0: i32) -> (i32, i32) {
    %c0_i32 = arith.constant 0 : i32
    %c0_i32_0 = arith.constant 0 : i32
    return %arg0, %c0_i32 : i32, i32
  }
}

</mosaic_0001>

<bundles_post_ra>
// kernel: tpu_custom_call.1
= control target key start
LH: loop header
LB: loop body
LE: loop exit
PB: predicated region body
PF: predicated region fallthrough
CT: control target
= control target key end

     0   :  { %11 = vsyncpa [#allocation3], 0  ;;  %s993_s0 = inlined_call_operand.hbm [shape: f32[16,64], index: 0, kind: input, shape index: {}]   ;;  %s994_s1 = inlined_call_operand.hbm [shape: f32[16,64], index: 1, kind: input, shape index: {}]   ;;  %s995_s2 = inlined_call_operand.hbm [shape: f32[16,64], index: 2, kind: input, shape index: {}]   ;;  %s996_s3 = inlined_call_operand.hbm [shape: f32[64,128], index: 3, kind: input, shape index: {}]   ;;  %s997_s4 = inlined_call_operand.hbm [shape: f32[64,128], index: 4, kind: input, shape index: {}]   ;;  %s998_s5 = inlined_call_operand.hbm [shape: f32[64,128], index: 5, kind: input, shape index: {}]   ;;  %s999_s6 = inlined_call_operand.hbm [shape: f32[16,128], index: 6, kind: output, shape index: {}]  }
   0x1   :  { %12 = vsyncpa [#allocation6], 0 }
   0x2   :  { %13 = vsyncpa [#allocation9], 0 }
   0x3   :  { %14 = vsyncpa [#allocation12], 0 }
   0x4   :  { %15 = vsyncpa [#allocation4], 0  ;;  %s800_s21 = smov [#allocation5]   ;;  %s801_s23 = smov [#allocation8]  }
   0x5   :  { %s33_s22 = sshll.u32 %s800_s21, 4  ;;  %s57_s24 = sshll.u32 %s801_s23, 4  ;;  %s34_s22 = int_to_ptr.vmem [resolvable:$true] %s33_s22  ;;  %s845_s24 = int_to_ptr.vmem [resolvable:$true] %s57_s24 }
   0x6   :  { %s636_s27 = scalar_lea.hbm %s994_s1, 256 }
   0x7   :  { %p637_p0 = scmp.ne.s32.totalorder %s994_s1, %s636_s27  ;;  %p640_p1 = scmp.lt.u32.totalorder %s636_s27, %s994_s1 }
   0x9   :  { %p642_p2 = pnand %p640_p1, %p637_p0 }
   0xb   :  { %645 = shalt.err (!%p642_p2)
}
   0xc   :  { %s646_s8 = scalar_lea.vmem %s34_s22, 256  ;;  %p651_p4 = scmp.lt.s32.totalorder %s34_s22, %s34_s22 }
   0xd   :  { %p647_p3 = scmp.ne.s32.totalorder %s34_s22, %s646_s8  ;;  %p652_p5 = scmp.lt.s32.totalorder %s646_s8, %s646_s8 }
   0xf   :  { %p653_p6 = por %p652_p5, %p651_p4 }
  0x11   :  { %p654_p7 = pnand %p653_p6, %p647_p3 }
  0x13   :  { %657 = shalt.err (!%p654_p7)
}
  0x14   :  { %s802_s9 = smov 128   ;;  %s803_s10 = smov 8  }
  0x15   :  { %39 = dma.hbm_to_vmem [thread:$0]  %s994_s1, 256, %s34_s22, [#allocation6], %s802_s9, %s802_s9, %s803_s10  }
  0x16   :  { %s658_s15 = scalar_lea.hbm %s996_s3, 1024 }
  0x17   :  { %p659_p8 = scmp.ne.s32.totalorder %s996_s3, %s658_s15  ;;  %p662_p9 = scmp.lt.u32.totalorder %s658_s15, %s996_s3 }
  0x19   :  { %p664_p10 = pnand %p662_p9, %p659_p8 }
  0x1b   :  { %667 = shalt.err (!%p664_p10)
}
  0x1c   :  { %s668_s20 = scalar_lea.vmem %s845_s24, 1024  ;;  %p673_p12 = scmp.lt.s32.totalorder %s845_s24, %s845_s24 }
  0x1d   :  { %p669_p11 = scmp.ne.s32.totalorder %s845_s24, %s668_s20  ;;  %p674_p13 = scmp.lt.s32.totalorder %s668_s20, %s668_s20 }
  0x1f   :  { %p675_p0 = por %p674_p13, %p673_p12 }
  0x21   :  { %p676_p1 = pnand %p675_p0, %p669_p11 }
  0x23   :  { %679 = shalt.err (!%p676_p1)
}
  0x24   :  { %63 = dma.hbm_to_vmem [thread:$0]  %s996_s3, 1024, %s845_s24, [#allocation9], %s802_s9, %s802_s9, %s803_s10  }
  0x25   :  { %s804_s22 = smov [#allocation2]   ;;  %s805_s25 = smov [#allocation7]  }
  0x26   :  { %s21_s23 = sshll.u32 %s804_s22, 4  ;;  %s45_s26 = sshll.u32 %s805_s25, 4  ;;  %s22_s23 = int_to_ptr.vmem [resolvable:$true] %s21_s23  ;;  %s882_s26 = int_to_ptr.vmem [resolvable:$true] %s45_s26 }
  0x27   :  { %s680_s29 = scalar_lea.hbm %s993_s0, 256 }
  0x28   :  { %p681_p2 = scmp.ne.s32.totalorder %s993_s0, %s680_s29  ;;  %p684_p3 = scmp.lt.u32.totalorder %s680_s29, %s993_s0 }
  0x2a   :  { %p686_p4 = pnand %p684_p3, %p681_p2 }
  0x2c   :  { %689 = shalt.err (!%p686_p4)
}
  0x2d   :  { %s690_s3 = scalar_lea.vmem %s22_s23, 256  ;;  %p695_p6 = scmp.lt.s32.totalorder %s22_s23, %s22_s23 }
  0x2e   :  { %p691_p5 = scmp.ne.s32.totalorder %s22_s23, %s690_s3  ;;  %p696_p7 = scmp.lt.s32.totalorder %s690_s3, %s690_s3 }
  0x30   :  { %p697_p8 = por %p696_p7, %p695_p6 }
  0x32   :  { %p698_p9 = pnand %p697_p8, %p691_p5 }
  0x34   :  { %701 = shalt.err (!%p698_p9)
}
  0x35   :  { %27 = dma.hbm_to_vmem [thread:$0]  %s993_s0, 256, %s22_s23, [#allocation3], %s802_s9, %s802_s9, %s803_s10  }
  0x36   :  { %s702_s15 = scalar_lea.hbm %s995_s2, 256 }
  0x37   :  { %p703_p10 = scmp.ne.s32.totalorder %s995_s2, %s702_s15  ;;  %p706_p11 = scmp.lt.u32.totalorder %s702_s15, %s995_s2 }
  0x39   :  { %p708_p12 = pnand %p706_p11, %p703_p10 }
  0x3b   :  { %711 = shalt.err (!%p708_p12)
}
  0x3c   :  { %s712_s20 = scalar_lea.vmem %s882_s26, 256  ;;  %p717_p0 = scmp.lt.s32.totalorder %s882_s26, %s882_s26 }
  0x3d   :  { %p713_p13 = scmp.ne.s32.totalorder %s882_s26, %s712_s20  ;;  %p718_p1 = scmp.lt.s32.totalorder %s712_s20, %s712_s20 }
  0x3f   :  { %p719_p2 = por %p718_p1, %p717_p0 }
  0x41   :  { %p720_p3 = pnand %p719_p2, %p713_p13 }
  0x43   :  { %723 = shalt.err (!%p720_p3)
}
  0x44   :  { %51 = dma.hbm_to_vmem [thread:$0]  %s995_s2, 256, %s882_s26, [#allocation6], %s802_s9, %s802_s9, %s803_s10  }
  0x45   :  { %s806_s21 = smov [#allocation10]   ;;  %s807_s23 = smov [#allocation11]  }
  0x46   :  { %s69_s22 = sshll.u32 %s806_s21, 4  ;;  %s81_s25 = sshll.u32 %s807_s23, 4  ;;  %s70_s22 = int_to_ptr.vmem [resolvable:$true] %s69_s22  ;;  %s919_s25 = int_to_ptr.vmem [resolvable:$true] %s81_s25 }
  0x47   :  { %s724_s29 = scalar_lea.hbm %s997_s4, 1024 }
  0x48   :  { %p725_p4 = scmp.ne.s32.totalorder %s997_s4, %s724_s29  ;;  %p728_p5 = scmp.lt.u32.totalorder %s724_s29, %s997_s4 }
  0x4a   :  { %p730_p6 = pnand %p728_p5, %p725_p4 }
  0x4c   :  { %733 = shalt.err (!%p730_p6)
}
  0x4d   :  { %s734_s2 = scalar_lea.vmem %s70_s22, 1024  ;;  %p739_p8 = scmp.lt.s32.totalorder %s70_s22, %s70_s22 }
  0x4e   :  { %p735_p7 = scmp.ne.s32.totalorder %s70_s22, %s734_s2  ;;  %p740_p9 = scmp.lt.s32.totalorder %s734_s2, %s734_s2 }
  0x50   :  { %p741_p10 = por %p740_p9, %p739_p8 }
  0x52   :  { %p742_p11 = pnand %p741_p10, %p735_p7 }
  0x54   :  { %745 = shalt.err (!%p742_p11)
}
  0x55   :  { %75 = dma.hbm_to_vmem [thread:$0]  %s997_s4, 1024, %s70_s22, [#allocation9], %s802_s9, %s802_s9, %s803_s10  }
  0x56   :  { %s746_s13 = scalar_lea.hbm %s998_s5, 1024 }
  0x57   :  { %p747_p12 = scmp.ne.s32.totalorder %s998_s5, %s746_s13  ;;  %p750_p13 = scmp.lt.u32.totalorder %s746_s13, %s998_s5 }
  0x59   :  { %p752_p0 = pnand %p750_p13, %p747_p12 }
  0x5b   :  { %755 = shalt.err (!%p752_p0)
}
  0x5c   :  { %s756_s18 = scalar_lea.vmem %s919_s25, 1024  ;;  %p761_p2 = scmp.lt.s32.totalorder %s919_s25, %s919_s25 }
  0x5d   :  { %p757_p1 = scmp.ne.s32.totalorder %s919_s25, %s756_s18  ;;  %p762_p3 = scmp.lt.s32.totalorder %s756_s18, %s756_s18 }
  0x5f   :  { %p763_p4 = por %p762_p3, %p761_p2 }
  0x61   :  { %p764_p5 = pnand %p763_p4, %p757_p1 }
  0x63   :  { %767 = shalt.err (!%p764_p5)
}
  0x64   :  { %87 = dma.hbm_to_vmem [thread:$0]  %s998_s5, 1024, %s919_s25, [#allocation12], %s802_s9, %s802_s9, %s803_s10  }
  0x65   :  { %790 = dma.done.wait [#allocation3], 256  }
  0x66   :  { %791 = vsyncadd [#allocation3], 4294967040 }
  0x67   :  { %792 = dma.done.wait [#allocation6], 512  }
  0x68   :  { %793 = vsyncadd [#allocation6], 4294966784 }
  0x69   :  { %794 = dma.done.wait [#allocation9], 2048  }
  0x6a   :  { %795 = vsyncadd [#allocation9], 4294965248 }
  0x6b   :  { %796 = dma.done.wait [#allocation12], 1024  }
  0x6c   :  { %797 = vsyncadd [#allocation12], 4294966272  ;;  %v108_v0 = vld [vmem:[#allocation8] sm:$0xff]  ;;  %v109_v1 = vld [vmem:[#allocation8 + $0x8] sm:$0xff]  ;;  %vm116_vm0 = vcmask 523264   ;;  %v392_v42 = vlaneseq  ;;  %s808_s5 = smov 64  }
  0x6d   :  { %v200_v2 = vld [vmem:[#allocation10] sm:$0xff]  ;;  %v566_v3 = vpack.c.bf16 %v109_v1, %v108_v0  ;;  %v201_v4 = vld [vmem:[#allocation10 + $0x8] sm:$0xff]  ;;  %v110_v5 = vld [vmem:[#allocation8 + $0x10] sm:$0xff]  ;;  %s809_s20 = smov [#allocation13]  }
  0x6e   :  { %v111_v6 = vld [vmem:[#allocation8 + $0x18] sm:$0xff]  ;;  %v582_v7 = vpack.c.bf16 %v201_v4, %v200_v2  ;;  %v202_v9 = vld [vmem:[#allocation10 + $0x10] sm:$0xff]  ;;  %v112_v11 = vld [vmem:[#allocation8 + $0x20] sm:$0xff]  ;;  %v393_v43 = vand.u32 127, %v392_v42  ;;  %s458_s0 = sshll.u32 %s809_s20, 4  ;;  %s459_s0 = int_to_ptr.vmem [resolvable:$true] %s458_s0 }
  0x6f   :  { %v570_v8 = vpack.c.bf16 %v111_v6, %v110_v5  ;;  %v203_v10 = vld [vmem:[#allocation10 + $0x18] sm:$0xff]  ;;  %567 = vmatprep.subr.bf16.mxu0 %v566_v3  ;;  %v113_v13 = vld [vmem:[#allocation8 + $0x28] sm:$0xff]  ;;  %v204_v14 = vld [vmem:[#allocation10 + $0x20] sm:$0xff]  ;;  %s768_s1 = scalar_lea.vmem %s459_s0, 256  ;;  %p773_p7 = scmp.lt.s32.totalorder %s459_s0, %s459_s0 }
  0x70   :  { %v586_v12 = vpack.c.bf16 %v203_v10, %v202_v9  ;;  %v205_v15 = vld [vmem:[#allocation10 + $0x28] sm:$0xff]  ;;  %583 = vmatprep.subr.bf16.mxu1 %v582_v7  ;;  %569 = vmatpush3.bf16.msra.mxu0 %v566_v3  ;;  %v574_v16 = vpack.c.bf16 %v113_v13, %v112_v11  ;;  %v106_v17 = vld [vmem:[#allocation2] sm:$0xff]  ;;  %v198_v18 = vld [vmem:[#allocation5] sm:$0xff]  ;;  %vm394_vm1 = vcmp.lt.s32.totalorder %v393_v43, 64  ;;  %p769_p6 = scmp.ne.s32.totalorder %s459_s0, %s768_s1  ;;  %p774_p8 = scmp.lt.s32.totalorder %s768_s1, %s768_s1 }
  0x71   :  { %585 = vmatpush3.bf16.msra.mxu1 %v582_v7  ;;  %571 = vmatprep.subr.bf16.mxu0 %v570_v8  ;;  %v590_v19 = vpack.c.bf16 %v205_v15, %v204_v14  ;;  %v114_v20 = vld [vmem:[#allocation8 + $0x30] sm:$0xff]  ;;  %v115_v21 = vld [vmem:[#allocation8 + $0x38] sm:$0xff]  ;;  %v291_v26 = vld [vmem:[#allocation11] sm:$0xff] }
  0x72   :  { %587 = vmatprep.subr.bf16.mxu1 %v586_v12  ;;  %525 = vmatprep.mubr.msk.f32.mxu0 %vm116_vm0, %v106_v17  ;;  %v206_v22 = vld [vmem:[#allocation10 + $0x30] sm:$0xff]  ;;  %v207_v23 = vld [vmem:[#allocation10 + $0x38] sm:$0xff]  ;;  %v578_v24 = vpack.c.bf16 %v115_v21, %v114_v20  ;;  %v292_v27 = vld [vmem:[#allocation11 + $0x8] sm:$0xff]  ;;  %p775_p9 = por %p774_p8, %p773_p7 }
  0x73   :  { %544 = vmatprep.mubr.msk.f32.mxu1 %vm116_vm0, %v198_v18  ;;  %v594_v25 = vpack.c.bf16 %v207_v23, %v206_v22  ;;  %v598_v28 = vpack.c.bf16 %v292_v27, %v291_v26  ;;  %v293_v29 = vld [vmem:[#allocation11 + $0x10] sm:$0xff]  ;;  %v294_v30 = vld [vmem:[#allocation11 + $0x18] sm:$0xff]  ;;  %v199_v32 = vld [vmem:[#allocation5 + $0x8] sm:$0xff] }
  0x74   :  { %573 = vmatpush3.bf16.msra.mxu0 %v570_v8  ;;  %v107_v31 = vld [vmem:[#allocation2 + $0x8] sm:$0xff]  ;;  %v602_v33 = vpack.c.bf16 %v294_v30, %v293_v29  ;;  %v295_v34 = vld [vmem:[#allocation11 + $0x20] sm:$0xff]  ;;  %v296_v35 = vld [vmem:[#allocation11 + $0x28] sm:$0xff]  ;;  %p776_p10 = pnand %p775_p9, %p769_p6 }
  0x75   :  { %589 = vmatpush3.bf16.msra.mxu1 %v586_v12  ;;  %575 = vmatprep.subr.bf16.mxu0 %v574_v16  ;;  %v289_v36 = vld [vmem:[#allocation7] sm:$0xff]  ;;  %v606_v37 = vpack.c.bf16 %v296_v35, %v295_v34  ;;  %v298_v39 = vld [vmem:[#allocation11 + $0x38] sm:$0xff] }
  0x76   :  { %591 = vmatprep.subr.bf16.mxu1 %v590_v19  ;;  %v297_v38 = vld [vmem:[#allocation11 + $0x30] sm:$0xff]  ;;  %v290_v41 = vld [vmem:[#allocation7 + $0x8] sm:$0xff] }
  0x77   :  { %v610_v40 = vpack.c.bf16 %v298_v39, %v297_v38 }
  0x78   :  { %577 = vmatpush3.bf16.msra.mxu0 %v574_v16 }
  0x79   :  { %593 = vmatpush3.bf16.msra.mxu1 %v590_v19  ;;  %579 = vmatprep.subr.bf16.mxu0 %v578_v24 }
  0x7a   :  { %595 = vmatprep.subr.bf16.mxu1 %v594_v25 }
  0x7c   :  { %581 = vmatpush3.bf16.msra.mxu0 %v578_v24 }
  0x7d   :  { %597 = vmatpush3.bf16.msra.mxu1 %v594_v25  ;;  %599 = vmatprep.subr.bf16.mxu0 %v598_v28 }
  0x7f   :  { %526 = vmatmul.mubr.msk.f32.vlgmr.msra.gmra.mrb[0].mxu0 %vm116_vm0, %v107_v31 }
  0x80   :  { %545 = vmatmul.mubr.msk.f32.vlgmr.msra.gmra.mrb[0].mxu1 %vm116_vm0, %v199_v32  ;;  %601 = vmatpush3.bf16.msra.mxu0 %v598_v28 }
  0x81   :  { %603 = vmatprep.subr.bf16.mxu0 %v602_v33  ;;  %563 = vmatprep.mubr.msk.f32.mxu0 %vm116_vm0, %v289_v36 }
  0x84   :  { %605 = vmatpush3.bf16.msra.mxu0 %v602_v33 }
  0x85   :  { %607 = vmatprep.subr.bf16.mxu0 %v606_v37 }
  0x88   :  { %609 = vmatpush3.bf16.msra.mxu0 %v606_v37 }
  0x89   :  { %611 = vmatprep.subr.bf16.mxu0 %v610_v40 }
  0x8c   :  { %613 = vmatpush3.bf16.msra.mxu0 %v610_v40 }
  0x8f   :  { %564 = vmatmul.mubr.msk.f32.vlgmr.msra.gmra.mrb[2].mxu0 %vm116_vm0, %v290_v41 }
 0x152   :  { %v527_v44 = vpop.f32.mrb[0].mxu0 }
 0x153   :  { %v546_v45 = vpop.f32.mrb[0].mxu1  ;;  %v189_v46 = vpop.f32.mrb[1].mxu0 }
 0x154   :  { %v280_v47 = vpop.f32.mrb[1].mxu1  ;;  %v389_v48 = vmul.f32 %v546_v45, %v527_v44 }
 0x155   :  { %v388_v49 = vmul.f32 %v280_v47, %v189_v46  ;;  %380 = vrot.lane.b32.xlu0 %v280_v47, %s808_s5 }
 0x156   :  { %v396_v50 = vsel %vm394_vm1, %v389_v48, 0.0  ;;  %v402_v52 = vsel %vm394_vm1, 0.0, %v389_v48 }
 0x157   :  { %399 = vadd.xlane.f32.xlu1 %v396_v50  ;;  %v395_v51 = vsel %vm394_vm1, %v388_v49, 0.0  ;;  %v401_v53 = vsel %vm394_vm1, 0.0, %v388_v49 }
 0x159   :  { %382 = vrot.lane.b32.xlu0 %v546_v45, %s808_s5 }
 0x15b   :  { %397 = vadd.xlane.f32.xlu1 %v395_v51 }
 0x15f   :  { %405 = vadd.xlane.f32.xlu1 %v402_v52 }
 0x162   :  { %v966_v54 = vpop.f32.mrb[2].mxu0 }
 0x163   :  { %v371_v55 = vpop.f32.mrb[3].mxu0 }
 0x178   :  { %403 = vadd.xlane.f32.xlu0 %v401_v53 }
 0x18e   :  { %386 = vrot.lane.b32.xlu0 %v966_v54, %s808_s5 }
 0x1c7   :  { %v381_v56 = vpop.permute.xlu0 %380 }
 0x1c8   :  { %v390_v59 = vmul.f32 %v381_v56, %v189_v46 }
 0x1ca   :  { %v407_v61 = vsel %vm394_vm1, %v390_v59, 0.0  ;;  %v413_v62 = vsel %vm394_vm1, 0.0, %v390_v59 }
 0x1cb   :  { %v383_v57 = vpop.permute.xlu0 %382 }
 0x1cc   :  { %v391_v58 = vmul.f32 %v527_v44, %v383_v57 }
 0x1ce   :  { %v408_v60 = vsel %vm394_vm1, %v391_v58, 0.0  ;;  %v414_v63 = vsel %vm394_vm1, 0.0, %v391_v58 }
 0x1cf   :  { %411 = vadd.xlane.f32.xlu1 %v408_v60 }
 0x1d3   :  { %409 = vadd.xlane.f32.xlu1 %v407_v61 }
 0x1d7   :  { %415 = vadd.xlane.f32.xlu1 %v413_v62 }
 0x1db   :  { %417 = vadd.xlane.f32.xlu1 %v414_v63 }
 0x1e4   :  { %v400_v0 = vpop.xlane.xlu1 %399 }
 0x1e8   :  { %v398_v1 = vpop.xlane.xlu1 %397 }
 0x1ec   :  { %384 = vrot.lane.b32.xlu1 %v371_v55, %s808_s5  ;;  %v406_v2 = vpop.xlane.xlu1 %405 }
 0x1ed   :  { %v420_v13 = vsel %vm394_vm1, %v400_v0, %v406_v2 }
 0x205   :  { %v404_v5 = vpop.xlane.xlu0 %403 }
 0x206   :  { %v419_v7 = vsel %vm394_vm1, %v398_v1, %v404_v5 }
 0x209   :  { %v387_v35 = vpop.permute.xlu0 %386 }
 0x25c   :  { %v412_v3 = vpop.xlane.xlu1 %411 }
 0x260   :  { %v410_v4 = vpop.xlane.xlu1 %409 }
 0x264   :  { %v416_v6 = vpop.xlane.xlu1 %415 }
 0x265   :  { %v421_v8 = vsel %vm394_vm1, %v410_v4, %v416_v6 }
 0x266   :  { %v423_v9 = vmax.f32 %v419_v7, %v421_v8 }
 0x268   :  { %v425_v10 = vsub.f32 %v419_v7, %v423_v9  ;;  %v431_v11 = vsub.f32 %v421_v8, %v423_v9  ;;  %v418_v12 = vpop.xlane.xlu1 %417 }
 0x269   :  { %v422_v14 = vsel %vm394_vm1, %v412_v3, %v418_v12 }
 0x26a   :  { %v427_v15 = vmul.f32 1.442695, %v425_v10  ;;  %v433_v16 = vmul.f32 1.442695, %v431_v11  ;;  %v424_v17 = vmax.f32 %v420_v13, %v422_v14 }
 0x26c   :  { %624 = vpow2.f32 %v427_v15  ;;  %v426_v18 = vsub.f32 %v420_v13, %v424_v17  ;;  %v432_v19 = vsub.f32 %v422_v14, %v424_v17  ;;  %v385_v29 = vpop.permute.xlu1 %384 }
 0x26d   :  { %626 = vpow2.f32 %v433_v16 }
 0x26e   :  { %v429_v20 = vmul.f32 1.442695, %v426_v18  ;;  %v435_v21 = vmul.f32 1.442695, %v432_v19 }
 0x270   :  { %628 = vpow2.f32 %v429_v20 }
 0x271   :  { %630 = vpow2.f32 %v435_v21 }
 0x276   :  { %v625_v22 = vpop.eup %624 }
 0x277   :  { %v627_v23 = vpop.eup %626 }
 0x278   :  { %v437_v24 = vadd.f32 %v627_v23, %v625_v22 }
 0x27a   :  { %v629_v25 = vpop.eup %628  ;;  %632 = vrcp.f32 %v437_v24 }
 0x27b   :  { %v631_v26 = vpop.eup %630 }
 0x27c   :  { %v438_v27 = vadd.f32 %v631_v26, %v629_v25 }
 0x27e   :  { %634 = vrcp.f32 %v438_v27 }
 0x284   :  { %v633_v28 = vpop.eup %632 }
 0x285   :  { %v441_v30 = vmul.f32 %v633_v28, %v625_v22  ;;  %v445_v31 = vmul.f32 %v633_v28, %v627_v23 }
 0x287   :  { %v443_v32 = vmul.f32 %v441_v30, %v371_v55  ;;  %v447_v33 = vmul.f32 %v445_v31, %v385_v29 }
 0x288   :  { %v635_v34 = vpop.eup %634 }
 0x289   :  { %v449_v36 = vadd.f32 %v447_v33, %v443_v32  ;;  %v442_v37 = vmul.f32 %v635_v34, %v629_v25  ;;  %v446_v38 = vmul.f32 %v635_v34, %v631_v26 }
 0x28b   :  { %451 = vst [vmem:[#allocation13] sm:$0xff] %v449_v36  ;;  %v444_v39 = vmul.f32 %v966_v54, %v442_v37  ;;  %v448_v40 = vmul.f32 %v446_v38, %v387_v35 }
 0x28d   :  { %v450_v41 = vadd.f32 %v448_v40, %v444_v39 }
 0x28f   :  { %452 = vst [vmem:[#allocation13 + $0x8] sm:$0xff] %v450_v41 }
 0x290   :  { %779 = shalt.err (!%p776_p10)
}
 0x291   :  { %s780_s23 = scalar_lea.hbm %s999_s6, 256 }
 0x292   :  { %p781_p11 = scmp.ne.s32.totalorder %s999_s6, %s780_s23  ;;  %p784_p12 = scmp.lt.u32.totalorder %s780_s23, %s999_s6 }
 0x294   :  { %p786_p13 = pnand %p784_p12, %p781_p11 }
 0x296   :  { %789 = shalt.err (!%p786_p13)
}
 0x297   :  { %464 = dma.vmem_to_hbm [thread:$0]  %s459_s0, 256, %s999_s6, [#allocation4], %s802_s9, %s802_s9, %s803_s10  }
 0x298   :  { %798 = dma.done.wait [#allocation4], 256  }
 0x299   :  { %799 = vsyncadd [#allocation4], 4294967040 }
 0x29a   :  { %468 = vsyncpa [#allocation3], 1 }
 0x29b   :  { %469 = vsyncpa [#allocation6], 1 }
 0x29c   :  { %470 = vsyncpa [#allocation9], 1 }
 0x29d   :  { %471 = vsyncpa [#allocation12], 1 }
 0x29e   :  { %472 = vsyncpa [#allocation4], 1 }

</bundles_post_ra>
